<compile_context>
chip_gen: v7x
topology: tpu7x:2x2x1
jax: 0.10.0
libtpu: 0.0.40
codegen_flags: <defaults>
</compile_context>

<pallas_src>
import jax
import jax.numpy as jnp
from jax.experimental import pallas as pl
from jax.experimental.pallas import tpu as pltpu

LANE = 512                      # last dim, multiple of 128 -> unmasked vst
MAX_BLOCK_BYTES = 2 * 1024 * 1024  # ~2 MiB per block buffer (safe on v7x)
_THRESH = 20.0                  # exp-overflow guard for the single-exp form


def _round_up(x, m):
    return ((x + m - 1) // m) * m


def _sublane_multiple(dtype):
    """Native sublane packing multiple for a dtype (8 f32 / 16 bf16 / 32 i8)."""
    bits = jnp.dtype(dtype).itemsize * 8
    if bits >= 32:
        return 8
    if bits == 16:
        return 16
    return 32


def mish_kernel(x_ref, o_ref):
    """Elementwise Mish on one (block_rows, LANE) tile.

    Single-exp rewrite of x * tanh(softplus(x)):
        t = exp(x);  tanh(softplus(x)) = t*(t+2) / (t*(t+2) + 2)
    Clamp the exp argument and select x for x > THRESH to avoid inf/inf.
    Exact divide (no approx reciprocal) to hold 1e-5 tolerance.
    """
    x = x_ref[...].astype(jnp.float32)
    t = jnp.exp(jnp.minimum(x, _THRESH))
    tt = t * (t + 2.0)
    y = x * (tt / (tt + 2.0))
    o_ref[...] = jnp.where(x > _THRESH, x, y).astype(o_ref.dtype)


def _choose_block_rows(rows, sub, itemsize):
    """Pick a block row count: lane-dense, sublane-aligned, <= ~2 MiB,
    and (when the input allows it) yielding >= 2 grid blocks so both
    v7x TensorCores get work and the pipeline can overlap DMA/compute."""
    if rows <= sub:
        return rows  # single full-extent block (allowed by the (8,128) rule)
    cap = max(sub, (MAX_BLOCK_BYTES // (LANE * itemsize) // sub) * sub)
    br = min(cap, _round_up(rows, sub))
    if pl.cdiv(rows, br) < 2:
        # shrink so we get at least 2 blocks
        br = max(sub, _round_up(pl.cdiv(rows, 2), sub))
    return br


def _run_slab(x2, block_rows):
    """Run the kernel over a (rows, LANE) slab."""
    rows = x2.shape[0]
    dtype = x2.dtype
    itemsize = jnp.dtype(dtype).itemsize
    grid = (pl.cdiv(rows, block_rows),)

    block_bytes = block_rows * LANE * itemsize
    # in + out, double-buffered, plus slack; keep well under v7x's 64 MiB.
    vmem_limit = min(32 * 1024 * 1024, 4 * block_bytes + 4 * 1024 * 1024)

    n = rows * LANE
    return pl.pallas_call(
        mish_kernel,
        out_shape=jax.ShapeDtypeStruct((rows, LANE), dtype),
        grid=grid,
        in_specs=[pl.BlockSpec((block_rows, LANE), lambda i: (i, 0))],
        out_specs=pl.BlockSpec((block_rows, LANE), lambda i: (i, 0)),
        compiler_params=pltpu.CompilerParams(
            dimension_semantics=("parallel",),
            vmem_limit_bytes=vmem_limit,
        ),
        cost_estimate=pl.CostEstimate(
            flops=8 * n,             # min/mul/add/add/div/mul/cmp/select
            transcendentals=1 * n,   # single exp
            bytes_accessed=2 * n * itemsize,
        ),
    )(x2)


def mish_forward(x):
    """Mish.forward for an arbitrary-shape tensor (any rank / float dtype)."""
    orig_shape = x.shape
    dtype = x.dtype
    n = x.size
    itemsize = jnp.dtype(dtype).itemsize
    sub = _sublane_multiple(dtype)

    if n % LANE == 0:
        # Fast path: no pad, no trailing slice -> exactly 2N bytes of HBM
        # traffic.  reshape of a contiguous array is a metadata-only bitcast.
        rows = n // LANE
        block_rows = _choose_block_rows(rows, sub, itemsize)
        out2 = _run_slab(x.reshape(rows, LANE), block_rows)
        return out2.reshape(orig_shape)

    # Ragged fallback (rare): pad to a lane-dense slab, then slice back.
    # Zero padding is benign for Mish (mish(0) == 0).
    rows = pl.cdiv(n, LANE)
    block_rows = _choose_block_rows(rows, sub, itemsize)
    rows_padded = _round_up(rows, sub)
    n_padded = rows_padded * LANE
    xf = jnp.ravel(x)
    xf = jnp.pad(xf, (0, n_padded - n))
    out2 = _run_slab(xf.reshape(rows_padded, LANE), block_rows)
    return out2.reshape(-1)[:n].reshape(orig_shape)


def mish_reference(x):
    """Pure-JAX (XLA) reference: x * tanh(softplus(x))."""
    return x * jnp.tanh(jax.nn.softplus(x))


if __name__ == "__main__":
    key = jax.random.PRNGKey(0)

    # Shape consistent with the module's typical usage: (batch, channels, H, W).
    N, C, H, W = 2, 4, 16, 16
    x = jax.random.normal(key, (N, C, H, W), jnp.float32) * 5.0  # both tails

    out = jax.block_until_ready(mish_forward(x))
    ref = jax.block_until_ready(mish_reference(x))

    assert out.shape == (N, C, H, W)
    assert out.dtype == x.dtype
    assert jnp.allclose(out, ref, rtol=1e-5, atol=1e-5), float(
        jnp.max(jnp.abs(out - ref))
    )

    # Also exercise the large-x select branch and a ragged (non-multiple) size.
    x_big = jnp.linspace(-30.0, 30.0, 2 * 4 * 16 * 16, dtype=jnp.float32).reshape(
        N, C, H, W
    )
    out_big = jax.block_until_ready(mish_forward(x_big))
    assert jnp.allclose(out_big, mish_reference(x_big), rtol=1e-5, atol=1e-5)

    x_ragged = jax.random.normal(jax.random.PRNGKey(1), (3, 5, 7), jnp.float32)
    out_r = jax.block_until_ready(mish_forward(x_ragged))
    assert jnp.allclose(out_r, mish_reference(x_ragged), rtol=1e-5, atol=1e-5)

    print("KERNEL_OK")
</pallas_src>

<mosaic_0001>
module attributes {stable_mosaic.version = 11 : i64} {
  func.func @mish_kernel(%arg0: i32, %arg1: memref<4x512xf32, #tpu.memory_space<vmem>>, %arg2: memref<4x512xf32, #tpu.memory_space<vmem>>) attributes {dimension_semantics = [#tpu.dimension_semantics<parallel>], iteration_bounds = array<i64: 1>, scalar_prefetch = 0 : i64, scratch_operands = 0 : i64, tpu.core_type = #tpu.core_type<tc>, window_params = [{transform_indices = @transform_0, window_bounds = array<i64: 4, 512>}, {transform_indices = @transform_1, window_bounds = array<i64: 4, 512>}]} {
    %c0 = arith.constant 0 : index
    %c0_0 = arith.constant 0 : index
    %0 = vector.load %arg1[%c0, %c0_0] : memref<4x512xf32, #tpu.memory_space<vmem>>, vector<4x512xf32>
    %cst = arith.constant 2.000000e+01 : f32
    %1 = vector.broadcast %cst : f32 to vector<4x512xf32>
    %2 = arith.minimumf %0, %1 : vector<4x512xf32>
    %3 = math.exp %2 : vector<4x512xf32>
    %cst_1 = arith.constant 2.000000e+00 : f32
    %4 = vector.broadcast %cst_1 : f32 to vector<4x512xf32>
    %5 = arith.addf %3, %4 : vector<4x512xf32>
    %6 = arith.mulf %3, %5 : vector<4x512xf32>
    %cst_2 = arith.constant 2.000000e+00 : f32
    %7 = vector.broadcast %cst_2 : f32 to vector<4x512xf32>
    %8 = arith.addf %6, %7 : vector<4x512xf32>
    %9 = arith.divf %6, %8 : vector<4x512xf32>
    %10 = arith.mulf %0, %9 : vector<4x512xf32>
    %cst_3 = arith.constant 2.000000e+01 : f32
    %11 = vector.broadcast %cst_3 : f32 to vector<4x512xf32>
    %12 = arith.cmpf ogt, %0, %11 : vector<4x512xf32>
    %13 = arith.select %12, %0, %10 : vector<4x512xi1>, vector<4x512xf32>
    %c0_4 = arith.constant 0 : index
    %c0_5 = arith.constant 0 : index
    %14 = vector.load %arg2[%c0_4, %c0_5] : memref<4x512xf32, #tpu.memory_space<vmem>>, vector<4x512xf32>
    tpu.vector_store %arg2[%c0_4, %c0_5], %13 {strides = array<i32>} : memref<4x512xf32, #tpu.memory_space<vmem>>, vector<4x512xf32>,
    return
  }
  func.func @transform_0(%arg0: i32) -> (i32, i32) {
    %c0_i32 = arith.constant 0 : i32
    %c0_i32_0 = arith.constant 0 : i32
    return %arg0, %c0_i32 : i32, i32
  }
  func.func @transform_1(%arg0: i32) -> (i32, i32) {
    %c0_i32 = arith.constant 0 : i32
    %c0_i32_0 = arith.constant 0 : i32
    return %arg0, %c0_i32 : i32, i32
  }
}

</mosaic_0001>

<bundles_post_ra>
// kernel: tpu_custom_call.1
= control target key start
LH: loop header
LB: loop body
LE: loop exit
PB: predicated region body
PF: predicated region fallthrough
CT: control target
= control target key end

     0   :  { %6 = vsyncpa [#allocation3], 0  ;;  %s156_s0 = inlined_call_operand.hbm [shape: f32[4,512], index: 0, kind: input, shape index: {}]   ;;  %s157_s1 = inlined_call_operand.hbm [shape: f32[4,512], index: 1, kind: output, shape index: {}]  }
   0x1   :  { %7 = vsyncpa [#allocation4], 0  ;;  %s120_s6 = smov [#allocation2]   ;;  %s72_s10 = scalar_lea.hbm %s156_s0, 256 }
   0x2   :  { %s14_s7 = sshll.u32 %s120_s6, 4  ;;  %p73_p0 = scmp.ne.s32.totalorder %s156_s0, %s72_s10  ;;  %s15_s7 = int_to_ptr.vmem [resolvable:$true] %s14_s7 }
   0x3   :  { %p76_p1 = scmp.lt.u32.totalorder %s72_s10, %s156_s0 }
   0x5   :  { %p78_p2 = pnand %p76_p1, %p73_p0 }
   0x7   :  { %81 = shalt.err (!%p78_p2)
}
   0x8   :  { %s82_s15 = scalar_lea.vmem %s15_s7, 256  ;;  %p87_p4 = scmp.lt.s32.totalorder %s15_s7, %s15_s7 }
   0x9   :  { %p83_p3 = scmp.ne.s32.totalorder %s15_s7, %s82_s15  ;;  %p88_p5 = scmp.lt.s32.totalorder %s82_s15, %s82_s15 }
   0xb   :  { %p89_p6 = por %p88_p5, %p87_p4 }
   0xd   :  { %p90_p7 = pnand %p89_p6, %p83_p3 }
   0xf   :  { %93 = shalt.err (!%p90_p7)
}
  0x10   :  { %17 = dma.hbm_to_vmem [thread:$0]  %s156_s0, 256, %s15_s7, [#allocation3]  }
  0x11   :  { %116 = dma.done.wait [#allocation3], 256  }
  0x12   :  { %117 = vsyncadd [#allocation3], 4294967040  ;;  %v21_v0 = vld [vmem:[#allocation2] sm:$0xff]  ;;  %v22_v1 = vld [vmem:[#allocation2 + $0x8] sm:$0xff]  ;;  %s121_s0 = smov [#allocation5]  }
  0x13   :  { %v23_v2 = vmin.f32 %v21_v0, 20.0  ;;  %v24_v3 = vmin.f32 %v22_v1, 20.0  ;;  %vm41_vm0 = vcmp.gt.f32.partialorder %v21_v0, 20.0  ;;  %s53_s18 = sshll.u32 %s121_s0, 4  ;;  %vm42_vm1 = vcmp.gt.f32.partialorder %v22_v1, 20.0  ;;  %s54_s18 = int_to_ptr.vmem [resolvable:$true] %s53_s18 }
  0x14   :  { %s94_s19 = scalar_lea.vmem %s54_s18, 256  ;;  %p99_p9 = scmp.lt.s32.totalorder %s54_s18, %s54_s18 }
  0x15   :  { %v25_v4 = vmul.f32 1.442695, %v23_v2  ;;  %v27_v5 = vmul.f32 1.442695, %v24_v3  ;;  %p95_p8 = scmp.ne.s32.totalorder %s54_s18, %s94_s19  ;;  %p100_p10 = scmp.lt.s32.totalorder %s94_s19, %s94_s19 }
  0x17   :  { %64 = vpow2.f32 %v25_v4  ;;  %p101_p11 = por %p100_p10, %p99_p9 }
  0x18   :  { %66 = vpow2.f32 %v27_v5 }
  0x19   :  { %p102_p12 = pnand %p101_p11, %p95_p8 }
  0x21   :  { %v65_v6 = vpop.eup %64 }
  0x22   :  { %v67_v7 = vpop.eup %66  ;;  %v29_v8 = vadd.f32 2.0, %v65_v6 }
  0x23   :  { %v30_v9 = vadd.f32 2.0, %v67_v7 }
  0x24   :  { %v31_v10 = vmul.f32 %v65_v6, %v29_v8 }
  0x25   :  { %v32_v11 = vmul.f32 %v67_v7, %v30_v9 }
  0x26   :  { %v33_v12 = vadd.f32 2.0, %v31_v10 }
  0x27   :  { %v34_v13 = vadd.f32 2.0, %v32_v11 }
  0x28   :  { %68 = vrcp.f32 %v33_v12 }
  0x29   :  { %70 = vrcp.f32 %v34_v13 }
  0x32   :  { %v69_v14 = vpop.eup %68 }
  0x33   :  { %v71_v15 = vpop.eup %70  ;;  %v36_v16 = vmul.f32 %v69_v14, %v31_v10 }
  0x34   :  { %v38_v17 = vmul.f32 %v71_v15, %v32_v11 }
  0x35   :  { %v39_v18 = vmul.f32 %v36_v16, %v21_v0 }
  0x36   :  { %v40_v19 = vmul.f32 %v38_v17, %v22_v1 }
  0x37   :  { %v43_v20 = vsel %vm41_vm0, %v21_v0, %v39_v18 }
  0x38   :  { %45 = vst [vmem:[#allocation5] sm:$0xff] %v43_v20  ;;  %v44_v21 = vsel %vm42_vm1, %v22_v1, %v40_v19 }
  0x39   :  { %46 = vst [vmem:[#allocation5 + $0x8] sm:$0xff] %v44_v21 }
  0x3a   :  { %105 = shalt.err (!%p102_p12)
}
  0x3b   :  { %s106_s22 = scalar_lea.hbm %s157_s1, 256 }
  0x3c   :  { %p107_p13 = scmp.ne.s32.totalorder %s157_s1, %s106_s22  ;;  %p110_p0 = scmp.lt.u32.totalorder %s106_s22, %s157_s1 }
  0x3e   :  { %p112_p1 = pnand %p110_p0, %p107_p13 }
  0x40   :  { %115 = shalt.err (!%p112_p1)
}
  0x41   :  { %56 = dma.vmem_to_hbm [thread:$0]  %s54_s18, 256, %s157_s1, [#allocation4]  }
  0x42   :  { %118 = dma.done.wait [#allocation4], 256  }
  0x43   :  { %119 = vsyncadd [#allocation4], 4294967040 }
  0x44   :  { %60 = vsyncpa [#allocation3], 1 }
  0x45   :  { %61 = vsyncpa [#allocation4], 1 }

</bundles_post_ra>
